<compile_context>
chip_gen: v6e
topology: v6e:2x2x1
jax: 0.10.0
libtpu: 0.0.40
codegen_flags: <defaults>
</compile_context>

<pallas_src>
import functools
import math

import jax
import jax.numpy as jnp
from jax.experimental import pallas as pl
from jax.experimental.pallas import tpu as pltpu


def _round_up(x, m):
    return (x + m - 1) // m * m


def _actor_kernel(x_ref, eps_ref,
                  w0_ref, b0_ref, w1_ref, b1_ref,
                  wmu_ref, bmu_ref, wls_ref, bls_ref,
                  out_ref, *, action_dim, log_std_min, log_std_max):
    # --- MLP trunk: Linear+ReLU, Linear+ReLU (bf16 matmul, f32 accumulate) ---
    x = x_ref[...]                                                    # (TB, D_pad) bf16
    h = jnp.dot(x, w0_ref[...], preferred_element_type=jnp.float32) + b0_ref[...]
    h = jnp.maximum(h, 0.0).astype(jnp.bfloat16)
    h = jnp.dot(h, w1_ref[...], preferred_element_type=jnp.float32) + b1_ref[...]
    h = jnp.maximum(h, 0.0).astype(jnp.bfloat16)

    # --- heads: mean / logstd (== torch.chunk of the 2*A-wide output) --------
    mean = jnp.dot(h, wmu_ref[...], preferred_element_type=jnp.float32) + bmu_ref[...]
    pre_ls = jnp.dot(h, wls_ref[...], preferred_element_type=jnp.float32) + bls_ref[...]

    t = jnp.tanh(pre_ls)
    logstd = log_std_min + 0.5 * (log_std_max - log_std_min) * (t + 1.0)
    std = jnp.exp(logstd)

    eps = eps_ref[...]                                                # (TB, A_pad) f32
    u = mean + std * eps
    a = jnp.tanh(u)

    # log N(u; mean, std): (u - mean) / std == eps exactly, so no divide needed
    logp_u = -logstd - 0.5 * eps * eps - 0.5 * math.log(2.0 * math.pi)
    # tanh change-of-variables: 2*(log2 - u - softplus(-2u)), stable softplus
    neg2u = -2.0 * u
    softplus = jnp.maximum(neg2u, 0.0) + jnp.log(1.0 + jnp.exp(-jnp.abs(neg2u)))
    logp_elem = logp_u - 2.0 * (math.log(2.0) - u - softplus)

    lane = jax.lax.broadcasted_iota(jnp.int32, logp_elem.shape, dimension=1)
    valid = lane < action_dim
    log_prob = jnp.sum(jnp.where(valid, logp_elem, 0.0), axis=-1, keepdims=True)  # (TB, 1)

    # lane-dense packed output: cols [0, A) = action, col A = summed log-prob
    packed = jnp.where(valid, a, jnp.where(lane == action_dim, log_prob, 0.0))
    out_ref[...] = packed.astype(out_ref.dtype)


@functools.partial(jax.jit,
                   static_argnames=("action_dim", "log_std_min", "log_std_max"))
def continuous_actor_forward(obs, params, noise_key, *, action_dim,
                             log_std_min=-5.0, log_std_max=2.0):
    """obs: (B, obs_dim) f32.  Returns (action (B, A), log_prob (B, 1))."""
    w0, b0, w1, b1, wmu, bmu, wls, bls = params
    B, obs_dim = obs.shape
    D_pad, H1 = w0.shape
    H2 = w1.shape[1]
    A_pad = wmu.shape[1]

    # Batch tiling: small batches pad to a sublane multiple, big ones tile by 256.
    TB = 256 if B >= 256 else _round_up(B, 8)
    B_pad = _round_up(B, TB)

    x = jnp.pad(obs.astype(jnp.bfloat16),
                ((0, B_pad - B), (0, D_pad - obs_dim)))
    eps = jax.random.normal(noise_key, (B_pad, A_pad), jnp.float32)

    flops = 2 * B_pad * (D_pad * H1 + H1 * H2 + 2 * H2 * A_pad)
    transcendentals = 5 * B_pad * A_pad            # tanh, exp, tanh, exp, log
    bytes_accessed = (x.size * 2 + eps.size * 4
                      + (w0.size + w1.size + wmu.size + wls.size) * 2
                      + (b0.size + b1.size + bmu.size + bls.size) * 4
                      + B_pad * A_pad * 4)

    kernel = functools.partial(_actor_kernel,
                               action_dim=action_dim,
                               log_std_min=float(log_std_min),
                               log_std_max=float(log_std_max))

    out = pl.pallas_call(
        kernel,
        out_shape=jax.ShapeDtypeStruct((B_pad, A_pad), jnp.float32),
        grid=(B_pad // TB,),
        in_specs=[
            pl.BlockSpec((TB, D_pad), lambda i: (i, 0)),     # x
            pl.BlockSpec((TB, A_pad), lambda i: (i, 0)),     # eps
            pl.BlockSpec((D_pad, H1), lambda i: (0, 0)),     # w0 (resident)
            pl.BlockSpec((1, H1), lambda i: (0, 0)),         # b0
            pl.BlockSpec((H1, H2), lambda i: (0, 0)),        # w1
            pl.BlockSpec((1, H2), lambda i: (0, 0)),         # b1
            pl.BlockSpec((H2, A_pad), lambda i: (0, 0)),     # w_mean
            pl.BlockSpec((1, A_pad), lambda i: (0, 0)),      # b_mean
            pl.BlockSpec((H2, A_pad), lambda i: (0, 0)),     # w_logstd
            pl.BlockSpec((1, A_pad), lambda i: (0, 0)),      # b_logstd
        ],
        out_specs=pl.BlockSpec((TB, A_pad), lambda i: (i, 0)),
        compiler_params=pltpu.CompilerParams(
            dimension_semantics=("parallel",)),
        cost_estimate=pl.CostEstimate(flops=flops,
                                      transcendentals=transcendentals,
                                      bytes_accessed=bytes_accessed),
    )(x, eps, w0, b0, w1, b1, wmu, bmu, wls, bls)

    action = out[:B, :action_dim]
    log_prob = out[:B, action_dim:action_dim + 1]
    return action, log_prob


def init_params(key, obs_dim, action_dim, hidden_dims=(256, 256)):
    """Orthogonal-init weights (like utils.orthogonal_init), zero biases.

    Weights are zero-padded to lane-aligned shapes and stored in bf16; the
    padded columns/rows contribute nothing to the real outputs.
    """
    D_pad = _round_up(obs_dim, 128)
    A_pad = _round_up(action_dim + 1, 128)   # +1 lane reserved for packed log-prob
    H1, H2 = hidden_dims
    ortho = jax.nn.initializers.orthogonal()
    k0, k1, k2, k3 = jax.random.split(key, 4)

    def pad(w, rows, cols):
        return jnp.pad(w, ((0, rows - w.shape[0]), (0, cols - w.shape[1])))

    w0 = pad(ortho(k0, (obs_dim, H1), jnp.float32), D_pad, H1).astype(jnp.bfloat16)
    w1 = ortho(k1, (H1, H2), jnp.float32).astype(jnp.bfloat16)
    wmu = pad(ortho(k2, (H2, action_dim), jnp.float32), H2, A_pad).astype(jnp.bfloat16)
    wls = pad(ortho(k3, (H2, action_dim), jnp.float32), H2, A_pad).astype(jnp.bfloat16)
    b0 = jnp.zeros((1, H1), jnp.float32)
    b1 = jnp.zeros((1, H2), jnp.float32)
    bmu = jnp.zeros((1, A_pad), jnp.float32)
    bls = jnp.zeros((1, A_pad), jnp.float32)
    return (w0, b0, w1, b1, wmu, bmu, wls, bls)


if __name__ == "__main__":
    B, obs_dim, action_dim = 4, 17, 6

    key = jax.random.PRNGKey(0)
    k_obs, k_par, k_eps = jax.random.split(key, 3)
    obs = jax.random.normal(k_obs, (B, obs_dim), dtype=jnp.float32)
    params = init_params(k_par, obs_dim, action_dim)

    action, log_prob = continuous_actor_forward(
        obs, params, k_eps, action_dim=action_dim)
    jax.block_until_ready((action, log_prob))

    assert action.shape == (B, action_dim) and action.dtype == jnp.float32
    assert log_prob.shape == (B, 1) and log_prob.dtype == jnp.float32
    assert bool(jnp.all(jnp.abs(action) < 1.0))          # tanh-squashed actions
    assert bool(jnp.all(jnp.isfinite(log_prob)))
    print("KERNEL_OK")
</pallas_src>

<mosaic_0001>
module attributes {stable_mosaic.version = 11 : i64} {
  func.func @_actor_kernel(%arg0: i32, %arg1: memref<8x128xbf16, #tpu.memory_space<vmem>>, %arg2: memref<8x128xf32, #tpu.memory_space<vmem>>, %arg3: memref<128x256xbf16, #tpu.memory_space<vmem>>, %arg4: memref<1x256xf32, #tpu.memory_space<vmem>>, %arg5: memref<256x256xbf16, #tpu.memory_space<vmem>>, %arg6: memref<1x256xf32, #tpu.memory_space<vmem>>, %arg7: memref<256x128xbf16, #tpu.memory_space<vmem>>, %arg8: memref<1x128xf32, #tpu.memory_space<vmem>>, %arg9: memref<256x128xbf16, #tpu.memory_space<vmem>>, %arg10: memref<1x128xf32, #tpu.memory_space<vmem>>, %arg11: memref<8x128xf32, #tpu.memory_space<vmem>>) attributes {dimension_semantics = [#tpu.dimension_semantics<parallel>], iteration_bounds = array<i64: 1>, scalar_prefetch = 0 : i64, scratch_operands = 0 : i64, tpu.core_type = #tpu.core_type<tc>, window_params = [{transform_indices = @transform_0, window_bounds = array<i64: 8, 128>}, {transform_indices = @transform_1, window_bounds = array<i64: 8, 128>}, {pipeline_mode = #tpu.pipeline_mode<synchronous>, transform_indices = @transform_2, window_bounds = array<i64: 128, 256>}, {pipeline_mode = #tpu.pipeline_mode<synchronous>, transform_indices = @transform_3, window_bounds = array<i64: 1, 256>}, {pipeline_mode = #tpu.pipeline_mode<synchronous>, transform_indices = @transform_4, window_bounds = array<i64: 256, 256>}, {pipeline_mode = #tpu.pipeline_mode<synchronous>, transform_indices = @transform_5, window_bounds = array<i64: 1, 256>}, {pipeline_mode = #tpu.pipeline_mode<synchronous>, transform_indices = @transform_6, window_bounds = array<i64: 256, 128>}, {pipeline_mode = #tpu.pipeline_mode<synchronous>, transform_indices = @transform_7, window_bounds = array<i64: 1, 128>}, {pipeline_mode = #tpu.pipeline_mode<synchronous>, transform_indices = @transform_8, window_bounds = array<i64: 256, 128>}, {pipeline_mode = #tpu.pipeline_mode<synchronous>, transform_indices = @transform_9, window_bounds = array<i64: 1, 128>}, {transform_indices = @transform_10, window_bounds = array<i64: 8, 128>}]} {
    %c0 = arith.constant 0 : index
    %c0_0 = arith.constant 0 : index
    %0 = vector.load %arg1[%c0, %c0_0] : memref<8x128xbf16, #tpu.memory_space<vmem>>, vector<8x128xbf16>
    %c0_1 = arith.constant 0 : index
    %c0_2 = arith.constant 0 : index
    %1 = vector.load %arg3[%c0_1, %c0_2] : memref<128x256xbf16, #tpu.memory_space<vmem>>, vector<128x256xbf16>
    %cst = arith.constant dense<0.000000e+00> : vector<8x256xf32>
    %2 = tpu.matmul %0, %1, %cst {dimension_numbers = #tpu.dot_dimension_numbers<[1], [0], [0], [1], [0, 0, 1, 1], [], []>} : vector<8x128xbf16>, vector<128x256xbf16>, vector<8x256xf32> -> vector<8x256xf32>
    %c0_3 = arith.constant 0 : index
    %c0_4 = arith.constant 0 : index
    %3 = vector.load %arg4[%c0_3, %c0_4] : memref<1x256xf32, #tpu.memory_space<vmem>>, vector<1x256xf32>
    %4 = vector.broadcast %3 : vector<1x256xf32> to vector<8x256xf32>
    %5 = arith.addf %2, %4 : vector<8x256xf32>
    %cst_5 = arith.constant 0.000000e+00 : f32
    %6 = vector.broadcast %cst_5 : f32 to vector<8x256xf32>
    %7 = arith.maximumf %5, %6 : vector<8x256xf32>
    %8 = arith.truncf %7 : vector<8x256xf32> to vector<8x256xbf16>
    %c0_6 = arith.constant 0 : index
    %c0_7 = arith.constant 0 : index
    %9 = vector.load %arg5[%c0_6, %c0_7] : memref<256x256xbf16, #tpu.memory_space<vmem>>, vector<256x256xbf16>
    %cst_8 = arith.constant dense<0.000000e+00> : vector<8x256xf32>
    %10 = tpu.matmul %8, %9, %cst_8 {dimension_numbers = #tpu.dot_dimension_numbers<[1], [0], [0], [1], [0, 0, 1, 1], [], []>} : vector<8x256xbf16>, vector<256x256xbf16>, vector<8x256xf32> -> vector<8x256xf32>
    %c0_9 = arith.constant 0 : index
    %c0_10 = arith.constant 0 : index
    %11 = vector.load %arg6[%c0_9, %c0_10] : memref<1x256xf32, #tpu.memory_space<vmem>>, vector<1x256xf32>
    %12 = vector.broadcast %11 : vector<1x256xf32> to vector<8x256xf32>
    %13 = arith.addf %10, %12 : vector<8x256xf32>
    %cst_11 = arith.constant 0.000000e+00 : f32
    %14 = vector.broadcast %cst_11 : f32 to vector<8x256xf32>
    %15 = arith.maximumf %13, %14 : vector<8x256xf32>
    %16 = arith.truncf %15 : vector<8x256xf32> to vector<8x256xbf16>
    %c0_12 = arith.constant 0 : index
    %c0_13 = arith.constant 0 : index
    %17 = vector.load %arg7[%c0_12, %c0_13] : memref<256x128xbf16, #tpu.memory_space<vmem>>, vector<256x128xbf16>
    %cst_14 = arith.constant dense<0.000000e+00> : vector<8x128xf32>
    %18 = tpu.matmul %16, %17, %cst_14 {dimension_numbers = #tpu.dot_dimension_numbers<[1], [0], [0], [1], [0, 0, 1, 1], [], []>} : vector<8x256xbf16>, vector<256x128xbf16>, vector<8x128xf32> -> vector<8x128xf32>
    %c0_15 = arith.constant 0 : index
    %c0_16 = arith.constant 0 : index
    %19 = vector.load %arg8[%c0_15, %c0_16] : memref<1x128xf32, #tpu.memory_space<vmem>>, vector<1x128xf32>
    %20 = vector.broadcast %19 : vector<1x128xf32> to vector<8x128xf32>
    %21 = arith.addf %18, %20 : vector<8x128xf32>
    %c0_17 = arith.constant 0 : index
    %c0_18 = arith.constant 0 : index
    %22 = vector.load %arg9[%c0_17, %c0_18] : memref<256x128xbf16, #tpu.memory_space<vmem>>, vector<256x128xbf16>
    %cst_19 = arith.constant dense<0.000000e+00> : vector<8x128xf32>
    %23 = tpu.matmul %16, %22, %cst_19 {dimension_numbers = #tpu.dot_dimension_numbers<[1], [0], [0], [1], [0, 0, 1, 1], [], []>} : vector<8x256xbf16>, vector<256x128xbf16>, vector<8x128xf32> -> vector<8x128xf32>
    %c0_20 = arith.constant 0 : index
    %c0_21 = arith.constant 0 : index
    %24 = vector.load %arg10[%c0_20, %c0_21] : memref<1x128xf32, #tpu.memory_space<vmem>>, vector<1x128xf32>
    %25 = vector.broadcast %24 : vector<1x128xf32> to vector<8x128xf32>
    %26 = arith.addf %23, %25 : vector<8x128xf32>
    %27 = math.tanh %26 : vector<8x128xf32>
    %cst_22 = arith.constant 1.000000e+00 : f32
    %28 = vector.broadcast %cst_22 : f32 to vector<8x128xf32>
    %29 = arith.addf %27, %28 : vector<8x128xf32>
    %cst_23 = arith.constant 3.500000e+00 : f32
    %30 = vector.broadcast %cst_23 : f32 to vector<8x128xf32>
    %31 = arith.mulf %30, %29 : vector<8x128xf32>
    %cst_24 = arith.constant -5.000000e+00 : f32
    %32 = vector.broadcast %cst_24 : f32 to vector<8x128xf32>
    %33 = arith.addf %32, %31 : vector<8x128xf32>
    %34 = math.exp %33 : vector<8x128xf32>
    %c0_25 = arith.constant 0 : index
    %c0_26 = arith.constant 0 : index
    %35 = vector.load %arg2[%c0_25, %c0_26] : memref<8x128xf32, #tpu.memory_space<vmem>>, vector<8x128xf32>
    %36 = arith.mulf %34, %35 : vector<8x128xf32>
    %37 = arith.addf %21, %36 : vector<8x128xf32>
    %38 = math.tanh %37 : vector<8x128xf32>
    %cst_27 = arith.constant 0.000000e+00 : f32
    %39 = vector.broadcast %cst_27 : f32 to vector<8x128xf32>
    %40 = arith.subf %39, %33 : vector<8x128xf32>
    %cst_28 = arith.constant 5.000000e-01 : f32
    %41 = vector.broadcast %cst_28 : f32 to vector<8x128xf32>
    %42 = arith.mulf %41, %35 : vector<8x128xf32>
    %43 = arith.mulf %42, %35 : vector<8x128xf32>
    %44 = arith.subf %40, %43 : vector<8x128xf32>
    %cst_29 = arith.constant 0.918938517 : f32
    %45 = vector.broadcast %cst_29 : f32 to vector<8x128xf32>
    %46 = arith.subf %44, %45 : vector<8x128xf32>
    %cst_30 = arith.constant -2.000000e+00 : f32
    %47 = vector.broadcast %cst_30 : f32 to vector<8x128xf32>
    %48 = arith.mulf %47, %37 : vector<8x128xf32>
    %cst_31 = arith.constant 0.000000e+00 : f32
    %49 = vector.broadcast %cst_31 : f32 to vector<8x128xf32>
    %50 = arith.maximumf %48, %49 : vector<8x128xf32>
    %51 = math.absf %48 : vector<8x128xf32>
    %cst_32 = arith.constant 0.000000e+00 : f32
    %52 = vector.broadcast %cst_32 : f32 to vector<8x128xf32>
    %53 = arith.subf %52, %51 : vector<8x128xf32>
    %54 = math.exp %53 : vector<8x128xf32>
    %cst_33 = arith.constant 1.000000e+00 : f32
    %55 = vector.broadcast %cst_33 : f32 to vector<8x128xf32>
    %56 = arith.addf %55, %54 : vector<8x128xf32>
    %57 = math.log %56 : vector<8x128xf32>
    %58 = arith.addf %50, %57 : vector<8x128xf32>
    %cst_34 = arith.constant 0.693147182 : f32
    %59 = vector.broadcast %cst_34 : f32 to vector<8x128xf32>
    %60 = arith.subf %59, %37 : vector<8x128xf32>
    %61 = arith.subf %60, %58 : vector<8x128xf32>
    %cst_35 = arith.constant 2.000000e+00 : f32
    %62 = vector.broadcast %cst_35 : f32 to vector<8x128xf32>
    %63 = arith.mulf %62, %61 : vector<8x128xf32>
    %64 = arith.subf %46, %63 : vector<8x128xf32>
    %65 = tpu.iota {dimensions = array<i32: 1>} : vector<8x128xi32>
    %c6_i32 = arith.constant 6 : i32
    %66 = vector.broadcast %c6_i32 : i32 to vector<8x128xi32>
    %67 = arith.cmpi slt, %65, %66 : vector<8x128xi32>
    %cst_36 = arith.constant 0.000000e+00 : f32
    %68 = vector.broadcast %cst_36 : f32 to vector<8x128xf32>
    %69 = arith.select %67, %64, %68 : vector<8x128xi1>, vector<8x128xf32>
    %cst_37 = arith.constant dense<0.000000e+00> : vector<8xf32>
    %70 = vector.multi_reduction <add>, %69, %cst_37 [1] : vector<8x128xf32> to vector<8xf32>
    %71 = vector.shape_cast %70 : vector<8xf32> to vector<8x1xf32>
    %c6_i32_38 = arith.constant 6 : i32
    %72 = vector.broadcast %c6_i32_38 : i32 to vector<8x128xi32>
    %73 = arith.cmpi eq, %65, %72 : vector<8x128xi32>
    %cst_39 = arith.constant 0.000000e+00 : f32
    %74 = vector.shape_cast %71 : vector<8x1xf32> to vector<8x1xf32>
    %75 = vector.broadcast %74 : vector<8x1xf32> to vector<8x128xf32>
    %76 = vector.broadcast %cst_39 : f32 to vector<8x128xf32>
    %77 = arith.select %73, %75, %76 : vector<8x128xi1>, vector<8x128xf32>
    %78 = arith.select %67, %38, %77 : vector<8x128xi1>, vector<8x128xf32>
    %c0_40 = arith.constant 0 : index
    %c0_41 = arith.constant 0 : index
    %79 = vector.load %arg11[%c0_40, %c0_41] : memref<8x128xf32, #tpu.memory_space<vmem>>, vector<8x128xf32>
    tpu.vector_store %arg11[%c0_40, %c0_41], %78 {strides = array<i32>} : memref<8x128xf32, #tpu.memory_space<vmem>>, vector<8x128xf32>,
    return
  }
  func.func @transform_0(%arg0: i32) -> (i32, i32) {
    %c0_i32 = arith.constant 0 : i32
    %c0_i32_0 = arith.constant 0 : i32
    return %arg0, %c0_i32 : i32, i32
  }
  func.func @transform_1(%arg0: i32) -> (i32, i32) {
    %c0_i32 = arith.constant 0 : i32
    %c0_i32_0 = arith.constant 0 : i32
    return %arg0, %c0_i32 : i32, i32
  }
  func.func @transform_2(%arg0: i32) -> (i32, i32) {
    %c0_i32 = arith.constant 0 : i32
    %c0_i32_0 = arith.constant 0 : i32
    %c0_i32_1 = arith.constant 0 : i32
    return %c0_i32, %c0_i32_0 : i32, i32
  }
  func.func @transform_3(%arg0: i32) -> (i32, i32) {
    %c0_i32 = arith.constant 0 : i32
    %c0_i32_0 = arith.constant 0 : i32
    %c0_i32_1 = arith.constant 0 : i32
    return %c0_i32, %c0_i32_0 : i32, i32
  }
  func.func @transform_4(%arg0: i32) -> (i32, i32) {
    %c0_i32 = arith.constant 0 : i32
    %c0_i32_0 = arith.constant 0 : i32
    %c0_i32_1 = arith.constant 0 : i32
    return %c0_i32, %c0_i32_0 : i32, i32
  }
  func.func @transform_5(%arg0: i32) -> (i32, i32) {
    %c0_i32 = arith.constant 0 : i32
    %c0_i32_0 = arith.constant 0 : i32
    %c0_i32_1 = arith.constant 0 : i32
    return %c0_i32, %c0_i32_0 : i32, i32
  }
  func.func @transform_6(%arg0: i32) -> (i32, i32) {
    %c0_i32 = arith.constant 0 : i32
    %c0_i32_0 = arith.constant 0 : i32
    %c0_i32_1 = arith.constant 0 : i32
    return %c0_i32, %c0_i32_0 : i32, i32
  }
  func.func @transform_7(%arg0: i32) -> (i32, i32) {
    %c0_i32 = arith.constant 0 : i32
    %c0_i32_0 = arith.constant 0 : i32
    %c0_i32_1 = arith.constant 0 : i32
    return %c0_i32, %c0_i32_0 : i32, i32
  }
  func.func @transform_8(%arg0: i32) -> (i32, i32) {
    %c0_i32 = arith.constant 0 : i32
    %c0_i32_0 = arith.constant 0 : i32
    %c0_i32_1 = arith.constant 0 : i32
    return %c0_i32, %c0_i32_0 : i32, i32
  }
  func.func @transform_9(%arg0: i32) -> (i32, i32) {
    %c0_i32 = arith.constant 0 : i32
    %c0_i32_0 = arith.constant 0 : i32
    %c0_i32_1 = arith.constant 0 : i32
    return %c0_i32, %c0_i32_0 : i32, i32
  }
  func.func @transform_10(%arg0: i32) -> (i32, i32) {
    %c0_i32 = arith.constant 0 : i32
    %c0_i32_0 = arith.constant 0 : i32
    return %arg0, %c0_i32 : i32, i32
  }
}

</mosaic_0001>

<bundles_post_ra>
// kernel: continuous_actor_forward.1
= control target key start
LH: loop header
LB: loop body
LE: loop exit
PB: predicated region body
PF: predicated region fallthrough
CT: control target
= control target key end

     0   :  { %15 = vsyncpa [#allocation3], 0  ;;  %s1325_s0 = inlined_call_operand.vmem [shape: bf16[8,128], index: 0, kind: input, shape index: {}]   ;;  %s1326_s1 = inlined_call_operand.vmem [shape: f32[8,128], index: 1, kind: input, shape index: {}]   ;;  %s1327_s2 = inlined_call_operand.hbm [shape: bf16[128,256], index: 2, kind: input, shape index: {}]   ;;  %s1328_s3 = inlined_call_operand.vmem [shape: f32[1,256], index: 3, kind: input, shape index: {}]   ;;  %s1329_s4 = inlined_call_operand.hbm [shape: bf16[256,256], index: 4, kind: input, shape index: {}]   ;;  %s1330_s5 = inlined_call_operand.vmem [shape: f32[1,256], index: 5, kind: input, shape index: {}]   ;;  %s1331_s6 = inlined_call_operand.hbm [shape: bf16[256,128], index: 6, kind: input, shape index: {}]   ;;  %s1332_s7 = inlined_call_operand.vmem [shape: f32[1,128], index: 7, kind: input, shape index: {}]   ;;  %s1333_s8 = inlined_call_operand.hbm [shape: bf16[256,128], index: 8, kind: input, shape index: {}]   ;;  %s1334_s9 = inlined_call_operand.vmem [shape: f32[1,128], index: 9, kind: input, shape index: {}]   ;;  %s1335_s10 = inlined_call_operand.vmem [shape: f32[8,128], index: 10, kind: output, shape index: {}]  }
   0x1   :  { %16 = vsyncpa [#allocation5], 0 }
   0x2   :  { %17 = vsyncpa [#allocation8], 0  ;;  %s1226_s13 = smov [#allocation4]   ;;  %s1227_s15 = smov [#allocation2]  }
   0x3   :  { %s41_s14 = sshll.u32 %s1226_s13, 4  ;;  %s27_s16 = sshll.u32 %s1227_s15, 4  ;;  %s42_s14 = int_to_ptr.vmem [resolvable:$true] %s41_s14  ;;  %s28_s16 = int_to_ptr.vmem [resolvable:$true] %s27_s16 }
   0x4   :  { %s1148_s17 = scalar_lea.vmem %s42_s14, 4096  ;;  %p1153_p1 = scmp.lt.s32.totalorder %s42_s14, %s42_s14 }
   0x5   :  { %p1149_p0 = scmp.ne.s32.totalorder %s42_s14, %s1148_s17  ;;  %p1154_p2 = scmp.lt.s32.totalorder %s1148_s17, %s1148_s17 }
   0x7   :  { %p1155_p3 = por %p1154_p2, %p1153_p1 }
   0x9   :  { %p1156_p4 = pnand %p1155_p3, %p1149_p0 }
   0xb   :  { %1159 = shalt.err (!%p1156_p4)
}
   0xc   :  { %s1228_s18 = smov 128   ;;  %s1229_s19 = smov 8  }
   0xd   :  { %47 = dma.hbm_to_vmem [thread:$0]  %s1329_s4, 4096, %s42_s14, [#allocation5], %s1228_s18, %s1228_s18, %s1229_s19  }
   0xe   :  { %s1168_s22 = scalar_lea.vmem %s28_s16, 2048  ;;  %p1173_p6 = scmp.lt.s32.totalorder %s28_s16, %s28_s16 }
   0xf   :  { %p1169_p5 = scmp.ne.s32.totalorder %s28_s16, %s1168_s22  ;;  %p1174_p7 = scmp.lt.s32.totalorder %s1168_s22, %s1168_s22 }
  0x11   :  { %p1175_p8 = por %p1174_p7, %p1173_p6 }
  0x13   :  { %p1176_p9 = pnand %p1175_p8, %p1169_p5 }
  0x15   :  { %1179 = shalt.err (!%p1176_p9)
}
  0x16   :  { %33 = dma.hbm_to_vmem [thread:$0]  %s1327_s2, 2048, %s28_s16, [#allocation3], %s1228_s18, %s1228_s18, %s1229_s19  }
  0x17   :  { %s1230_s25 = smov [#allocation6]  }
  0x18   :  { %s55_s26 = sshll.u32 %s1230_s25, 4  ;;  %s56_s26 = int_to_ptr.vmem [resolvable:$true] %s55_s26 }
  0x19   :  { %s1188_s27 = scalar_lea.vmem %s56_s26, 2048  ;;  %p1193_p11 = scmp.lt.s32.totalorder %s56_s26, %s56_s26 }
  0x1a   :  { %p1189_p10 = scmp.ne.s32.totalorder %s56_s26, %s1188_s27  ;;  %p1194_p12 = scmp.lt.s32.totalorder %s1188_s27, %s1188_s27 }
  0x1c   :  { %p1195_p13 = por %p1194_p12, %p1193_p11 }
  0x1e   :  { %p1196_p0 = pnand %p1195_p13, %p1189_p10 }
  0x20   :  { %1199 = shalt.err (!%p1196_p0)
}
  0x21   :  { %s1231_s4 = smov 64   ;;  %s1232_s28 = smov 4  }
  0x22   :  { %61 = dma.hbm_to_vmem [thread:$0]  %s1331_s6, 2048, %s56_s26, [#allocation5], %s1231_s4, %s1231_s4, %s1232_s28  }
  0x23   :  { %s1233_s11 = smov [#allocation7]  }
  0x24   :  { %s69_s12 = sshll.u32 %s1233_s11, 4  ;;  %s70_s12 = int_to_ptr.vmem [resolvable:$true] %s69_s12 }
  0x25   :  { %s1208_s2 = scalar_lea.vmem %s70_s12, 2048  ;;  %p1213_p2 = scmp.lt.s32.totalorder %s70_s12, %s70_s12 }
  0x26   :  { %p1209_p1 = scmp.ne.s32.totalorder %s70_s12, %s1208_s2  ;;  %p1214_p3 = scmp.lt.s32.totalorder %s1208_s2, %s1208_s2 }
  0x28   :  { %p1215_p4 = por %p1214_p3, %p1213_p2 }
  0x2a   :  { %p1216_p5 = pnand %p1215_p4, %p1209_p1 }
  0x2c   :  { %1219 = shalt.err (!%p1216_p5)
}
  0x2d   :  { %75 = dma.hbm_to_vmem [thread:$0]  %s1333_s8, 2048, %s70_s12, [#allocation8], %s1231_s4, %s1231_s4, %s1232_s28  }
  0x2e   :  { %1220 = dma.done.wait [#allocation3], 2048  }
  0x2f   :  { %1221 = vsyncadd [#allocation3], 4294965248 }
  0x30   :  { %1222 = dma.done.wait [#allocation5], 6144  }
  0x31   :  { %1223 = vsyncadd [#allocation5], 4294961152 }
  0x32   :  { %1224 = dma.done.wait [#allocation8], 2048  }
  0x33   :  { %1225 = vsyncadd [#allocation8], 4294965248  ;;  %v1234_v0 = vmov 0   ;;  %v1026_v1 = vld [vmem:[#allocation2 + $0x74] ss:$8 sps:$4 sm:$0xff]   ;;  %v1102_v54 = vld [vmem:[#allocation6 + $0x68] sm:$0xff]   ;;  %v110_v62 = vlaneseq }
  0x34   :  { %232 = vmatprep.mubr.bf16.mxu0 %v1234_v0  ;;  %v1028_v2 = vld [vmem:[#allocation2 + $0x70] ss:$8 sps:$4 sm:$0xff]   ;;  %200 = vmatprep.subr.bf16.mxu0 %v1026_v1  ;;  %v1029_v3 = vld [vmem:[#allocation2 + $0x64] ss:$8 sps:$4 sm:$0xff]   ;;  %v1031_v4 = vld [vmem:[#allocation2 + $0x60] ss:$8 sps:$4 sm:$0xff]  }
  0x35   :  { %201 = vmatpush1.bf16.msra.mxu0 %v1028_v2  ;;  %v1032_v5 = vld [vmem:[#allocation2 + $0x54] ss:$8 sps:$4 sm:$0xff]   ;;  %v1034_v6 = vld [vmem:[#allocation2 + $0x50] ss:$8 sps:$4 sm:$0xff]   ;;  %v1035_v7 = vld [vmem:[#allocation2 + $0x44] ss:$8 sps:$4 sm:$0xff]  }
  0x36   :  { %202 = vmatprep.subr.bf16.mxu0 %v1029_v3  ;;  %v1037_v8 = vld [vmem:[#allocation2 + $0x40] ss:$8 sps:$4 sm:$0xff]   ;;  %v1038_v9 = vld [vmem:[#allocation2 + $0x34] ss:$8 sps:$4 sm:$0xff]   ;;  %v1052_v11 = vld [vmem:[#allocation4 + $0x70] ss:$8 sps:$4 sm:$0xff]  }
  0x37   :  { %v1050_v10 = vld [vmem:[#allocation4 + $0x74] ss:$8 sps:$4 sm:$0xff]   ;;  %v1053_v12 = vld [vmem:[#allocation4 + $0x64] ss:$8 sps:$4 sm:$0xff]   ;;  %v1040_v13 = vld [vmem:[#allocation2 + $0x30] ss:$8 sps:$4 sm:$0xff]  }
  0x38   :  { %449 = vmatprep.subr.bf16.mxu1 %v1050_v10  ;;  %v1055_v14 = vld [vmem:[#allocation4 + $0x60] ss:$8 sps:$4 sm:$0xff]   ;;  %v1056_v15 = vld [vmem:[#allocation4 + $0x54] ss:$8 sps:$4 sm:$0xff]   ;;  %v1041_v16 = vld [vmem:[#allocation2 + $0x24] ss:$8 sps:$4 sm:$0xff]  }
  0x39   :  { %203 = vmatpush1.bf16.msra.mxu0 %v1031_v4  ;;  %450 = vmatpush1.bf16.msra.mxu1 %v1052_v11  ;;  %v1043_v17 = vld [vmem:[#allocation2 + $0x20] ss:$8 sps:$4 sm:$0xff]   ;;  %v1058_v18 = vld [vmem:[#allocation4 + $0x50] ss:$8 sps:$4 sm:$0xff]   ;;  %v1059_v19 = vld [vmem:[#allocation4 + $0x44] ss:$8 sps:$4 sm:$0xff]  }
  0x3a   :  { %204 = vmatprep.subr.bf16.mxu0 %v1032_v5  ;;  %451 = vmatprep.subr.bf16.mxu1 %v1053_v12  ;;  %v1044_v20 = vld [vmem:[#allocation2 + $0x14] ss:$8 sps:$4 sm:$0xff]   ;;  %v1046_v21 = vld [vmem:[#allocation2 + $0x10] ss:$8 sps:$4 sm:$0xff]   ;;  %v1061_v22 = vld [vmem:[#allocation4 + $0x40] ss:$8 sps:$4 sm:$0xff]  }
  0x3b   :  { %v1062_v23 = vld [vmem:[#allocation4 + $0x34] ss:$8 sps:$4 sm:$0xff]   ;;  %v1047_v24 = vld [vmem:[#allocation2 + $0x4] ss:$8 sps:$4 sm:$0xff]   ;;  %v1049_v25 = vld [vmem:[#allocation2] ss:$8 sps:$4 sm:$0xff]  }
  0x3c   :  { %v1064_v26 = vld [vmem:[#allocation4 + $0x30] ss:$8 sps:$4 sm:$0xff]   ;;  %v1065_v27 = vld [vmem:[#allocation4 + $0x24] ss:$8 sps:$4 sm:$0xff]   ;;  %v91_v28 = vld [vmem:[%s1325_s0] sm:$0xf] }
  0x3d   :  { %205 = vmatpush1.bf16.msra.mxu0 %v1034_v6  ;;  %452 = vmatpush1.bf16.msra.mxu1 %v1055_v14  ;;  %v1067_v29 = vld [vmem:[#allocation4 + $0x20] ss:$8 sps:$4 sm:$0xff]   ;;  %v1068_v30 = vld [vmem:[#allocation4 + $0x14] ss:$8 sps:$4 sm:$0xff]   ;;  %v1070_v31 = vld [vmem:[#allocation4 + $0x10] ss:$8 sps:$4 sm:$0xff]  }
  0x3e   :  { %206 = vmatprep.subr.bf16.mxu0 %v1035_v7  ;;  %453 = vmatprep.subr.bf16.mxu1 %v1056_v15  ;;  %v1071_v32 = vld [vmem:[#allocation4 + $0x4] ss:$8 sps:$4 sm:$0xff]   ;;  %v1073_v33 = vld [vmem:[#allocation4] ss:$8 sps:$4 sm:$0xff]   ;;  %v1074_v34 = vld [vmem:[#allocation4 + $0xf4] ss:$8 sps:$4 sm:$0xff]  }
  0x3f   :  { %v1076_v35 = vld [vmem:[#allocation4 + $0xf0] ss:$8 sps:$4 sm:$0xff]   ;;  %v1077_v36 = vld [vmem:[#allocation4 + $0xe4] ss:$8 sps:$4 sm:$0xff]   ;;  %v1079_v37 = vld [vmem:[#allocation4 + $0xe0] ss:$8 sps:$4 sm:$0xff]  }
  0x40   :  { %v1080_v38 = vld [vmem:[#allocation4 + $0xd4] ss:$8 sps:$4 sm:$0xff]   ;;  %v1082_v39 = vld [vmem:[#allocation4 + $0xd0] ss:$8 sps:$4 sm:$0xff]   ;;  %v1083_v40 = vld [vmem:[#allocation4 + $0xc4] ss:$8 sps:$4 sm:$0xff]  }
  0x41   :  { %207 = vmatpush1.bf16.msra.mxu0 %v1037_v8  ;;  %454 = vmatpush1.bf16.msra.mxu1 %v1058_v18  ;;  %v1085_v41 = vld [vmem:[#allocation4 + $0xc0] ss:$8 sps:$4 sm:$0xff]   ;;  %v1086_v42 = vld [vmem:[#allocation4 + $0xb4] ss:$8 sps:$4 sm:$0xff]   ;;  %v1088_v43 = vld [vmem:[#allocation4 + $0xb0] ss:$8 sps:$4 sm:$0xff]  }
  0x42   :  { %208 = vmatprep.subr.bf16.mxu0 %v1038_v9  ;;  %455 = vmatprep.subr.bf16.mxu1 %v1059_v19  ;;  %v1089_v44 = vld [vmem:[#allocation4 + $0xa4] ss:$8 sps:$4 sm:$0xff]   ;;  %v1091_v45 = vld [vmem:[#allocation4 + $0xa0] ss:$8 sps:$4 sm:$0xff]   ;;  %v1092_v46 = vld [vmem:[#allocation4 + $0x94] ss:$8 sps:$4 sm:$0xff]  }
  0x43   :  { %v1094_v47 = vld [vmem:[#allocation4 + $0x90] ss:$8 sps:$4 sm:$0xff]   ;;  %v1095_v48 = vld [vmem:[#allocation4 + $0x84] ss:$8 sps:$4 sm:$0xff]   ;;  %v1097_v49 = vld [vmem:[#allocation4 + $0x80] ss:$8 sps:$4 sm:$0xff]  }
  0x44   :  { %v1098_v50 = vld [vmem:[#allocation6 + $0x78] sm:$0xff]   ;;  %v1100_v52 = vld [vmem:[#allocation6 + $0x70] sm:$0xff]   ;;  %v1103_v55 = vld [vmem:[#allocation6 + $0x28] sm:$0xff]   ;;  %v111_v63 = vshrl.u32 %v110_v62, 7 }
  0x45   :  { %209 = vmatpush1.bf16.msra.mxu0 %v1040_v13  ;;  %456 = vmatpush1.bf16.msra.mxu1 %v1061_v22  ;;  %v1099_v51 = vld [vmem:[#allocation6 + $0x38] sm:$0xff]   ;;  %v1101_v53 = vld [vmem:[#allocation6 + $0x30] sm:$0xff]   ;;  %v1104_v56 = vld [vmem:[#allocation6 + $0x60] sm:$0xff]  }
  0x46   :  { %210 = vmatprep.subr.bf16.mxu0 %v1041_v16  ;;  %457 = vmatprep.subr.bf16.mxu1 %v1062_v23  ;;  %v1105_v57 = vld [vmem:[#allocation6 + $0x20] sm:$0xff]   ;;  %v1106_v58 = vld [vmem:[#allocation6 + $0x58] sm:$0xff]   ;;  %v1108_v60 = vld [vmem:[#allocation6 + $0x50] sm:$0xff]   ;;  %v112_v0 = vsub.s32 0, %v111_v63  ;;  %v116_v2 = vsub.s32 1, %v111_v63 }
  0x47   :  { %v1107_v59 = vld [vmem:[#allocation6 + $0x18] sm:$0xff]   ;;  %v1109_v61 = vld [vmem:[#allocation6 + $0x10] sm:$0xff]   ;;  %v108_v1 = vld [vmem:[%s1328_s3] sm:$0x3] }
  0x48   :  { %v113_v3 = vrot.slane %v108_v1, %v112_v0  ;;  %v117_v4 = vrot.slane %v108_v1, %v116_v2  ;;  %v1110_v15 = vld [vmem:[#allocation6 + $0x48] sm:$0xff]   ;;  %v1113_v18 = vld [vmem:[#allocation6] sm:$0xff]   ;;  %v1114_v19 = vld [vmem:[#allocation7 + $0x78] sm:$0xff]  }
  0x49   :  { %211 = vmatpush1.bf16.msra.mxu0 %v1043_v17  ;;  %458 = vmatpush1.bf16.msra.mxu1 %v1064_v26  ;;  %v1111_v16 = vld [vmem:[#allocation6 + $0x8] sm:$0xff]   ;;  %v1112_v17 = vld [vmem:[#allocation6 + $0x40] sm:$0xff]  }
  0x4a   :  { %212 = vmatprep.subr.bf16.mxu0 %v1044_v20  ;;  %459 = vmatprep.subr.bf16.mxu1 %v1065_v27  ;;  %v277_v20 = vld [vmem:[%s1330_s5] sm:$0x3] }
  0x4b   :  { %v286_v22 = vrot.slane %v277_v20, %v116_v2  ;;  %v938_v2 = vld [vmem:[%s1332_s7] ss:$0 sm:$0xff] }
  0x4d   :  { %213 = vmatpush1.bf16.msra.mxu0 %v1046_v21  ;;  %460 = vmatpush1.bf16.msra.mxu1 %v1067_v29  ;;  %v282_v21 = vrot.slane %v277_v20, %v112_v0 }
  0x4e   :  { %214 = vmatprep.subr.bf16.mxu0 %v1047_v24  ;;  %461 = vmatprep.subr.bf16.mxu1 %v1068_v30 }
  0x51   :  { %215 = vmatpush1.bf16.msra.mxu0 %v1049_v25  ;;  %462 = vmatpush1.bf16.msra.mxu1 %v1070_v31 }
  0x52   :  { %463 = vmatprep.subr.bf16.mxu1 %v1071_v32  ;;  %973 = vmatprep.subr.bf16.mxu0 %v1098_v50  ;;  %v1115_v32 = vld [vmem:[#allocation7 + $0x38] sm:$0xff]  }
  0x54   :  { %233 = vmatmul.mubr.bf16.vlgmr.msra.gmra.mxu0 %v91_v28 }
  0x55   :  { %464 = vmatpush1.bf16.msra.mxu1 %v1073_v33  ;;  %974 = vmatpush3.bf16.msra.mxu0 %v1099_v51 }
  0x56   :  { %465 = vmatprep.subr.bf16.mxu1 %v1074_v34  ;;  %975 = vmatprep.subr.bf16.mxu0 %v1100_v52  ;;  %v1116_v34 = vld [vmem:[#allocation7 + $0x70] sm:$0xff]  }
  0x59   :  { %466 = vmatpush2.bf16.msra.mxu1 %v1076_v35  ;;  %976 = vmatpush3.bf16.msra.mxu0 %v1101_v53  ;;  %v1117_v35 = vld [vmem:[#allocation7 + $0x30] sm:$0xff]  }
  0x5a   :  { %467 = vmatprep.subr.bf16.mxu1 %v1077_v36  ;;  %977 = vmatprep.subr.bf16.mxu0 %v1102_v54  ;;  %v1118_v36 = vld [vmem:[#allocation7 + $0x68] sm:$0xff]   ;;  %v955_v54 = vld [vmem:[%s1334_s9] ss:$0 sm:$0xff] }
  0x5d   :  { %468 = vmatpush2.bf16.msra.mxu1 %v1079_v37  ;;  %978 = vmatpush3.bf16.msra.mxu0 %v1103_v55  ;;  %v1119_v37 = vld [vmem:[#allocation7 + $0x28] sm:$0xff]  }
  0x5e   :  { %469 = vmatprep.subr.bf16.mxu1 %v1080_v38  ;;  %979 = vmatprep.subr.bf16.mxu0 %v1104_v56  ;;  %v1120_v38 = vld [vmem:[#allocation7 + $0x60] sm:$0xff]  }
  0x61   :  { %470 = vmatpush2.bf16.msra.mxu1 %v1082_v39  ;;  %980 = vmatpush3.bf16.msra.mxu0 %v1105_v57  ;;  %v1121_v39 = vld [vmem:[#allocation7 + $0x20] sm:$0xff]  }
  0x62   :  { %471 = vmatprep.subr.bf16.mxu1 %v1083_v40  ;;  %981 = vmatprep.subr.bf16.mxu0 %v1106_v58  ;;  %v1122_v40 = vld [vmem:[#allocation7 + $0x58] sm:$0xff]  }
  0x65   :  { %472 = vmatpush2.bf16.msra.mxu1 %v1085_v41  ;;  %982 = vmatpush3.bf16.msra.mxu0 %v1107_v59  ;;  %v1123_v41 = vld [vmem:[#allocation7 + $0x18] sm:$0xff]  }
  0x66   :  { %473 = vmatprep.subr.bf16.mxu1 %v1086_v42  ;;  %983 = vmatprep.subr.bf16.mxu0 %v1108_v60  ;;  %v1124_v42 = vld [vmem:[#allocation7 + $0x50] sm:$0xff]  }
  0x69   :  { %474 = vmatpush2.bf16.msra.mxu1 %v1088_v43  ;;  %984 = vmatpush3.bf16.msra.mxu0 %v1109_v61  ;;  %v1125_v43 = vld [vmem:[#allocation7 + $0x10] sm:$0xff]  }
  0x6a   :  { %475 = vmatprep.subr.bf16.mxu1 %v1089_v44  ;;  %985 = vmatprep.subr.bf16.mxu0 %v1110_v15  ;;  %v1126_v44 = vld [vmem:[#allocation7 + $0x48] sm:$0xff]  }
  0x6d   :  { %476 = vmatpush2.bf16.msra.mxu1 %v1091_v45  ;;  %986 = vmatpush3.bf16.msra.mxu0 %v1111_v16  ;;  %v1127_v45 = vld [vmem:[#allocation7 + $0x8] sm:$0xff]  }
  0x6e   :  { %477 = vmatprep.subr.bf16.mxu1 %v1092_v46  ;;  %987 = vmatprep.subr.bf16.mxu0 %v1112_v17  ;;  %v1128_v46 = vld [vmem:[#allocation7 + $0x40] sm:$0xff]  }
  0x71   :  { %478 = vmatpush2.bf16.msra.mxu1 %v1094_v47  ;;  %988 = vmatpush3.bf16.msra.mxu0 %v1113_v18  ;;  %v1129_v47 = vld [vmem:[#allocation7] sm:$0xff]  }
  0x72   :  { %479 = vmatprep.subr.bf16.mxu1 %v1095_v48  ;;  %995 = vmatprep.subr.bf16.mxu0 %v1114_v19 }
  0x75   :  { %480 = vmatpush2.bf16.msra.mxu1 %v1097_v49 }
 0x114   :  { %v234_v5 = vpop.f32.mrf.mxu0 }
 0x115   :  { %v235_v6 = vadd.f32 %v234_v5, %v113_v3 }
 0x116   :  { %v236_v7 = vpop.f32.mrf.mxu0 }
 0x117   :  { %v237_v8 = vadd.f32 %v236_v7, %v117_v4  ;;  %v241_v9 = vmax.f32 %v235_v6, 0.0  ;;  %v850_v4 = vld [vmem:[%s1326_s1] sm:$0xff] }
 0x118   :  { %v238_v10 = vpop.f32.mrf.mxu0 }
 0x119   :  { %v242_v11 = vmax.f32 %v237_v8, 0.0  ;;  %v243_v14 = vpack.c.bf16 %v241_v9, %v241_v9 }
 0x11a   :  { %v239_v12 = vpop.f32.mrf.mxu0 }
 0x11b   :  { %v244_v13 = vpack.c.bf16 %v242_v11, %v242_v11 }
 0x11d   :  { %481 = vmatprep.mubr.bf16.mxu1 %v244_v13 }
 0x11e   :  { %482 = vmatmul.mubr.bf16.vlgmr.msra.gmra.mxu1 %v243_v14  ;;  %v855_v14 = vmul.f32 0.5, %v850_v4 }
 0x120   :  { %v856_v16 = vmul.f32 %v855_v14, %v850_v4 }
 0x1de   :  { %v483_v23 = vpop.f32.mrf.mxu1 }
 0x1df   :  { %v484_v24 = vadd.f32 %v483_v23, %v282_v21  ;;  %v874_v23 = vand.u32 127, %v110_v62 }
 0x1e0   :  { %v485_v25 = vpop.f32.mrf.mxu1 }
 0x1e1   :  { %v486_v26 = vadd.f32 %v485_v25, %v286_v22  ;;  %v490_v27 = vmax.f32 %v484_v24, 0.0  ;;  %vm875_vm0 = vcmp.lt.s32.totalorder %v874_v23, 6  ;;  %vm879_vm1 = vcmp.eq.s32.totalorder %v874_v23, 6 }
 0x1e2   :  { %v487_v28 = vpop.f32.mrf.mxu1 }
 0x1e3   :  { %v491_v29 = vmax.f32 %v486_v26, 0.0  ;;  %v492_v33 = vpack.c.bf16 %v490_v27, %v490_v27 }
 0x1e4   :  { %v488_v30 = vpop.f32.mrf.mxu1 }
 0x1e5   :  { %v493_v31 = vpack.c.bf16 %v491_v29, %v491_v29 }
 0x1e7   :  { %661 = vmatprep.mubr.bf16.mxu0 %v493_v31 }
 0x1e8   :  { %662 = vmatmul.mubr.bf16.vlgmr.msra.gmra.mxu0 %v492_v33 }
 0x1e9   :  { %996 = vmatpush3.bf16.msra.mxu0 %v1115_v32  ;;  %836 = vmatprep.mubr.bf16.mxu0 %v493_v31 }
 0x1ea   :  { %997 = vmatprep.subr.bf16.mxu0 %v1116_v34 }
 0x1ed   :  { %998 = vmatpush3.bf16.msra.mxu0 %v1117_v35 }
 0x1ee   :  { %999 = vmatprep.subr.bf16.mxu0 %v1118_v36 }
 0x1f1   :  { %1000 = vmatpush3.bf16.msra.mxu0 %v1119_v37 }
 0x1f2   :  { %1001 = vmatprep.subr.bf16.mxu0 %v1120_v38 }
 0x1f5   :  { %1002 = vmatpush3.bf16.msra.mxu0 %v1121_v39 }
 0x1f6   :  { %1003 = vmatprep.subr.bf16.mxu0 %v1122_v40 }
 0x1f9   :  { %1004 = vmatpush3.bf16.msra.mxu0 %v1123_v41 }
 0x1fa   :  { %1005 = vmatprep.subr.bf16.mxu0 %v1124_v42 }
 0x1fd   :  { %1006 = vmatpush3.bf16.msra.mxu0 %v1125_v43 }
 0x1fe   :  { %1007 = vmatprep.subr.bf16.mxu0 %v1126_v44 }
 0x201   :  { %1008 = vmatpush3.bf16.msra.mxu0 %v1127_v45 }
 0x202   :  { %1009 = vmatprep.subr.bf16.mxu0 %v1128_v46 }
 0x205   :  { %1010 = vmatpush3.bf16.msra.mxu0 %v1129_v47 }
 0x208   :  { %837 = vmatmul.mubr.bf16.vlgmr.msra.gmra.mxu0 %v492_v33 }
 0x2a8   :  { %v989_v48 = vpop.f32.mrf.mxu0 }
 0x2aa   :  { %v990_v49 = vpop.f32.mrf.mxu0 }
 0x2ab   :  { %v991_v50 = vadd.f32 %v990_v49, %v989_v48 }
 0x2ac   :  { %v992_v51 = vpop.f32.mrf.mxu0 }
 0x2ad   :  { %v664_v5 = vadd.f32 %v991_v50, %v938_v2 }
 0x2ae   :  { %v993_v52 = vpop.f32.mrf.mxu0 }
 0x2c8   :  { %v1011_v53 = vpop.f32.mrf.mxu0 }
 0x2ca   :  { %v1012_v55 = vpop.f32.mrf.mxu0 }
 0x2cb   :  { %v1013_v56 = vadd.f32 %v1012_v55, %v1011_v53 }
 0x2cc   :  { %v1014_v57 = vpop.f32.mrf.mxu0 }
 0x2cd   :  { %v839_v58 = vadd.f32 %v1013_v56, %v955_v54 }
 0x2ce   :  { %v1015_v59 = vpop.f32.mrf.mxu0 }
 0x2cf   :  { %1130 = vtanh.f32 %v839_v58 }
 0x2dc   :  { %v1131_v60 = vpop.eup %1130 }
 0x2dd   :  { %v845_v61 = vadd.f32 1.0, %v1131_v60 }
 0x2df   :  { %v846_v63 = vmul.f32 3.5, %v845_v61 }
 0x2e1   :  { %v847_v0 = vadd.f32 -5.0, %v846_v63 }
 0x2e3   :  { %v848_v1 = vmul.f32 1.442695, %v847_v0  ;;  %v854_v15 = vsub.f32 0.0, %v847_v0 }
 0x2e5   :  { %1132 = vpow2.f32 %v848_v1  ;;  %v857_v20 = vsub.f32 %v854_v15, %v856_v16 }
 0x2e7   :  { %v972_v25 = vadd.f32 -0.9189385, %v857_v20 }
 0x2f2   :  { %v1133_v3 = vpop.eup %1132 }
 0x2f3   :  { %v851_v6 = vmul.f32 %v1133_v3, %v850_v4 }
 0x2f5   :  { %v852_v7 = vadd.f32 %v851_v6, %v664_v5 }
 0x2f7   :  { %v859_v8 = vmul.f32 -2.0, %v852_v7  ;;  %v869_v22 = vsub.f32 0.6931472, %v852_v7 }
 0x2f9   :  { %v861_v9 = vand.u32 2147483647, %v859_v8  ;;  %v860_v18 = vmax.f32 %v859_v8, 0.0 }
 0x2fb   :  { %v862_v10 = vsub.f32 0.0, %v861_v9 }
 0x2fd   :  { %v863_v11 = vmul.f32 1.442695, %v862_v10 }
 0x2ff   :  { %1134 = vpow2.f32 %v863_v11 }
 0x30c   :  { %v1135_v12 = vpop.eup %1134 }
 0x30d   :  { %v865_v13 = vadd.f32 1.0, %v1135_v12 }
 0x30f   :  { %1136 = vlog2.f32 %v865_v13 }
 0x310   :  { %1138 = vtanh.f32 %v852_v7 }
 0x31c   :  { %v1137_v17 = vpop.eup %1136 }
 0x31d   :  { %v867_v19 = vmul.f32 0.6931472, %v1137_v17  ;;  %v1139_v30 = vpop.eup %1138 }
 0x31f   :  { %v868_v21 = vadd.f32 %v867_v19, %v860_v18 }
 0x321   :  { %v870_v24 = vsub.f32 %v869_v22, %v868_v21 }
 0x323   :  { %v871_v26 = vmul.f32 2.0, %v870_v24 }
 0x325   :  { %v872_v27 = vsub.f32 %v972_v25, %v871_v26 }
 0x327   :  { %v876_v28 = vsel %vm875_vm0, %v872_v27, 0.0 }
 0x328   :  { %877 = vadd.xlane.f32.xlu0 %v876_v28 }
 0x3b1   :  { %v878_v29 = vpop.xlane.xlu0 %877 }
 0x3b2   :  { %v880_v31 = vsel %vm879_vm1, %v878_v29, 0.0 }
 0x3b3   :  { %v881_v32 = vsel %vm875_vm0, %v1139_v30, %v880_v31 }
 0x3b4   :  { %882 = vst [vmem:[%s1335_s10] sm:$0xff] %v881_v32 }
 0x3b5   :  { %887 = vsyncpa [#allocation3], 1 }
 0x3b6   :  { %888 = vsyncpa [#allocation5], 1 }
 0x3b7   :  { %889 = vsyncpa [#allocation8], 1 }

</bundles_post_ra>
